<compile_context>
chip_gen: v7x
topology: tpu7x:2x2x1
jax: 0.10.0
libtpu: 0.0.40
codegen_flags: <defaults>
</compile_context>

<pallas_src>
import functools

import jax
import jax.numpy as jnp
import numpy as np
from jax.experimental import pallas as pl
from jax.experimental.pallas import tpu as pltpu


def _cdiv(a, b):
    return -(-a // b)


def channel_attention_kernel(x_ref, w1_ref, w2_ref, out_ref, sum_ref, max_ref,
                             *, hw, tile_hw, bt, needs_mask):
    # x_ref:   (bt, C, tile_hw)  spatial tile of bt batch elements
    # w1_ref:  (C_hid, C)        first 1x1 conv weight (f32, resident)
    # w2_ref:  (C, C_hid)        second 1x1 conv weight (f32, resident)
    # out_ref: (bt, C, 1)
    # sum_ref / max_ref: (bt, C, 1) f32 VMEM accumulators
    k = pl.program_id(1)

    @pl.when(k == 0)
    def _init():
        sum_ref[...] = jnp.zeros_like(sum_ref)
        max_ref[...] = jnp.full_like(max_ref, -jnp.inf)

    x = x_ref[...].astype(jnp.float32)                       # (bt, C, tile_hw)
    if needs_mask:
        # Last spatial tile may overrun H*W; padded lanes must not contribute.
        lane = jax.lax.broadcasted_iota(jnp.int32, x.shape, 2) + k * tile_hw
        valid = lane < hw
        x_sum = jnp.where(valid, x, 0.0)
        x_max = jnp.where(valid, x, -jnp.inf)
    else:
        x_sum = x
        x_max = x

    sum_ref[...] += jnp.sum(x_sum, axis=2, keepdims=True)    # (bt, C, 1)
    max_ref[...] = jnp.maximum(max_ref[...],
                               jnp.max(x_max, axis=2, keepdims=True))

    @pl.when(k == pl.num_programs(1) - 1)
    def _finalize():
        w1 = w1_ref[...]                                     # (C_hid, C)
        w2 = w2_ref[...]                                     # (C, C_hid)
        inv_hw = 1.0 / hw
        c = sum_ref.shape[1]
        col = jax.lax.broadcasted_iota(jnp.int32, (c, 2), 1)
        for i in range(bt):                                  # static unroll (bt small)
            avg = sum_ref[i] * inv_hw                        # (C, 1)
            mx = max_ref[i]                                  # (C, 1)
            # Fused FC over both pooled branches: RHS = [avg | max] -> (C, 2)
            pooled = jnp.where(col == 0, avg, mx)            # (C, 2)
            h = jnp.maximum(
                jnp.dot(w1, pooled, preferred_element_type=jnp.float32), 0.0)
            y = jnp.dot(w2, h, preferred_element_type=jnp.float32)   # (C, 2)
            att = jax.nn.sigmoid(jnp.sum(y, axis=1, keepdims=True))  # (C, 1)
            out_ref[i] = att.astype(out_ref.dtype)


def channel_attention(x, w1, w2, *, tile_hw=None, batch_tile=None):
    """CBAM ChannelAttention forward.

    x:  (B, C, H, W);  w1: (C//ratio, C, 1, 1);  w2: (C, C//ratio, 1, 1).
    Returns the sigmoid attention map of shape (B, C, 1, 1).
    """
    B, C, H, W = x.shape
    HW = H * W
    C_hid = w1.shape[0]
    x_flat = x.reshape(B, C, HW)
    # Pre-cast once in the wrapper: the resident weight blocks need no per-step cast.
    w1m = w1.reshape(C_hid, C).astype(jnp.float32)
    w2m = w2.reshape(C, C_hid).astype(jnp.float32)

    # --- Spatial tile: multiple of 128 lanes (or the full extent), sized so one
    # block stays ~<= 2 MiB; double-buffered this fits every generation's scoped
    # VMEM default (16 MiB v5e / 32 MiB v6e / v7x) with lots of headroom.
    if tile_hw is None:
        if HW <= 2048:
            tile_hw = HW
        else:
            cap = (2 * 1024 * 1024) // (C * x.dtype.itemsize)
            tile_hw = max(128, min(2048, (cap // 128) * 128))
    assert tile_hw == HW or tile_hw % 128 == 0, (
        "tile_hw must be a multiple of 128 or equal to H*W")
    n_hw = _cdiv(HW, tile_hw)
    needs_mask = (HW % tile_hw) != 0

    # --- Batch tile: amortize the ~0.35us fixed cost per grid step when the
    # per-step payload would otherwise be tiny.
    if batch_tile is None:
        batch_tile = 1
        step_bytes = C * min(tile_hw, HW) * x.dtype.itemsize
        while (batch_tile < B and B % (batch_tile * 2) == 0
               and step_bytes * batch_tile * 2 <= (1 << 20)):
            batch_tile *= 2
    assert B % batch_tile == 0, "batch_tile must divide B"
    bt = batch_tile

    kernel = functools.partial(
        channel_attention_kernel,
        hw=HW, tile_hw=tile_hw, bt=bt, needs_mask=needs_mask)

    cost = pl.CostEstimate(
        flops=2 * B * C * HW + B * 4 * C * C_hid * 2,
        transcendentals=B * C,
        bytes_accessed=(B * C * HW * x.dtype.itemsize
                        + (C_hid * C + C * C_hid) * 4
                        + B * C * x.dtype.itemsize),
    )

    out = pl.pallas_call(
        kernel,
        out_shape=jax.ShapeDtypeStruct((B, C, 1), x.dtype),
        grid_spec=pltpu.PrefetchScalarGridSpec(
            num_scalar_prefetch=0,
            grid=(B // bt, n_hw),
            in_specs=[
                pl.BlockSpec((bt, C, tile_hw), lambda b, k: (b, 0, k)),
                pl.BlockSpec((C_hid, C), lambda b, k: (0, 0)),
                pl.BlockSpec((C, C_hid), lambda b, k: (0, 0)),
            ],
            out_specs=pl.BlockSpec((bt, C, 1), lambda b, k: (b, 0, 0)),
            scratch_shapes=[
                pltpu.VMEM((bt, C, 1), jnp.float32),   # running sum
                pltpu.VMEM((bt, C, 1), jnp.float32),   # running max
            ],
        ),
        compiler_params=pltpu.CompilerParams(
            dimension_semantics=("parallel", "arbitrary")),
        cost_estimate=cost,
    )(x_flat, w1m, w2m)
    return out.reshape(B, C, 1, 1)


def channel_attention_ref(x, w1, w2):
    # Pure-JAX reference matching the PyTorch module.
    B, C, H, W = x.shape
    C_hid = w1.shape[0]
    w1m = w1.reshape(C_hid, C)
    w2m = w2.reshape(C, C_hid)
    avg = jnp.mean(x, axis=(2, 3))                      # (B, C)
    mx = jnp.max(x, axis=(2, 3))                        # (B, C)

    def fc(v):                                          # (B, C)
        h = jnp.maximum(v @ w1m.T, 0.0)                 # (B, C_hid)
        return h @ w2m.T                                # (B, C)

    out = jax.nn.sigmoid(fc(avg) + fc(mx))
    return out.reshape(B, C, 1, 1)


if __name__ == "__main__":
    key = jax.random.PRNGKey(0)
    B, C = 2, 32                       # in_planes=32 -> hidden = 32 // 16 = 2
    C_hid = C // 16

    k1, k2, kx = jax.random.split(key, 3)
    w1 = jax.random.normal(k1, (C_hid, C, 1, 1), dtype=jnp.float32) * 0.1
    w2 = jax.random.normal(k2, (C, C_hid, 1, 1), dtype=jnp.float32) * 0.1

    configs = [
        ((B, C, 16, 16), None),   # single spatial tile (HW <= 2048)
        ((B, C, 16, 16), 128),    # 2 full spatial tiles -> accumulator path
        ((B, C, 13, 13), 128),    # partial last tile -> in-kernel masking path
    ]
    for i, (shape, thw) in enumerate(configs):
        x = jax.random.normal(jax.random.fold_in(kx, i), shape, dtype=jnp.float32)
        out = jax.block_until_ready(channel_attention(x, w1, w2, tile_hw=thw))
        ref = jax.block_until_ready(channel_attention_ref(x, w1, w2))
        assert out.shape == (shape[0], shape[1], 1, 1), out.shape
        np.testing.assert_allclose(np.asarray(out), np.asarray(ref),
                                   rtol=1e-5, atol=1e-5)
    print("KERNEL_OK")
</pallas_src>

<mosaic_0001>
module attributes {stable_mosaic.version = 11 : i64} {
  func.func @channel_attention_kernel(%arg0: i32, %arg1: i32, %arg2: memref<2x32x256xf32, #tpu.memory_space<vmem>>, %arg3: memref<2x32xf32, #tpu.memory_space<vmem>>, %arg4: memref<32x2xf32, #tpu.memory_space<vmem>>, %arg5: memref<2x32x1xf32, #tpu.memory_space<vmem>>, %arg6: memref<2x32x1xf32, #tpu.memory_space<vmem>>, %arg7: memref<2x32x1xf32, #tpu.memory_space<vmem>>) attributes {dimension_semantics = [#tpu.dimension_semantics<parallel>, #tpu.dimension_semantics<arbitrary>], iteration_bounds = array<i64: 1, 1>, scalar_prefetch = 0 : i64, scratch_operands = 2 : i64, tpu.core_type = #tpu.core_type<tc>, window_params = [{transform_indices = @transform_0, window_bounds = array<i64: 2, 32, 256>}, {pipeline_mode = #tpu.pipeline_mode<synchronous>, transform_indices = @transform_1, window_bounds = array<i64: 2, 32>}, {pipeline_mode = #tpu.pipeline_mode<synchronous>, transform_indices = @transform_2, window_bounds = array<i64: 32, 2>}, {transform_indices = @transform_3, window_bounds = array<i64: 2, 32, 1>}]} {
    %c0_i32 = arith.constant 0 : i32
    %0 = arith.cmpi eq, %arg1, %c0_i32 : i32
    %1 = arith.extui %0 : i1 to i32
    %c0_i32_0 = arith.constant 0 : i32
    %2 = arith.cmpi ne, %1, %c0_i32_0 : i32
    scf.if %2 {
      %cst_18 = arith.constant 0.000000e+00 : f32
      %17 = vector.broadcast %cst_18 : f32 to vector<2x32x1xf32>
      %c0_19 = arith.constant 0 : index
      %c0_20 = arith.constant 0 : index
      %c0_21 = arith.constant 0 : index
      %18 = vector.load %arg6[%c0_19, %c0_20, %c0_21] : memref<2x32x1xf32, #tpu.memory_space<vmem>>, vector<2x32x1xf32>
      tpu.vector_store %arg6[%c0_19, %c0_20, %c0_21], %17 {strides = array<i32>} : memref<2x32x1xf32, #tpu.memory_space<vmem>>, vector<2x32x1xf32>,
      %cst_22 = arith.constant 0xFF800000 : f32
      %19 = vector.broadcast %cst_22 : f32 to vector<2x32x1xf32>
      %c0_23 = arith.constant 0 : index
      %c0_24 = arith.constant 0 : index
      %c0_25 = arith.constant 0 : index
      %20 = vector.load %arg7[%c0_23, %c0_24, %c0_25] : memref<2x32x1xf32, #tpu.memory_space<vmem>>, vector<2x32x1xf32>
      tpu.vector_store %arg7[%c0_23, %c0_24, %c0_25], %19 {strides = array<i32>} : memref<2x32x1xf32, #tpu.memory_space<vmem>>, vector<2x32x1xf32>,
    } else {
    }
    %c0 = arith.constant 0 : index
    %c0_1 = arith.constant 0 : index
    %c0_2 = arith.constant 0 : index
    %3 = vector.load %arg2[%c0, %c0_1, %c0_2] : memref<2x32x256xf32, #tpu.memory_space<vmem>>, vector<2x32x256xf32>
    %c0_3 = arith.constant 0 : index
    %c0_4 = arith.constant 0 : index
    %c0_5 = arith.constant 0 : index
    %4 = vector.load %arg6[%c0_3, %c0_4, %c0_5] : memref<2x32x1xf32, #tpu.memory_space<vmem>>, vector<2x32x1xf32>
    %cst = arith.constant dense<0.000000e+00> : vector<2x32xf32>
    %5 = vector.multi_reduction <add>, %3, %cst [2] : vector<2x32x256xf32> to vector<2x32xf32>
    %6 = vector.shape_cast %5 : vector<2x32xf32> to vector<2x32x1xf32>
    %7 = arith.addf %4, %6 : vector<2x32x1xf32>
    %c0_6 = arith.constant 0 : index
    %c0_7 = arith.constant 0 : index
    %c0_8 = arith.constant 0 : index
    %8 = vector.load %arg6[%c0_6, %c0_7, %c0_8] : memref<2x32x1xf32, #tpu.memory_space<vmem>>, vector<2x32x1xf32>
    tpu.vector_store %arg6[%c0_6, %c0_7, %c0_8], %7 {strides = array<i32>} : memref<2x32x1xf32, #tpu.memory_space<vmem>>, vector<2x32x1xf32>,
    %c0_9 = arith.constant 0 : index
    %c0_10 = arith.constant 0 : index
    %c0_11 = arith.constant 0 : index
    %9 = vector.load %arg7[%c0_9, %c0_10, %c0_11] : memref<2x32x1xf32, #tpu.memory_space<vmem>>, vector<2x32x1xf32>
    %cst_12 = arith.constant dense<0xFF800000> : vector<2x32xf32>
    %10 = vector.multi_reduction <maximumf>, %3, %cst_12 [2] : vector<2x32x256xf32> to vector<2x32xf32>
    %11 = vector.shape_cast %10 : vector<2x32xf32> to vector<2x32x1xf32>
    %12 = arith.maximumf %9, %11 : vector<2x32x1xf32>
    %c0_13 = arith.constant 0 : index
    %c0_14 = arith.constant 0 : index
    %c0_15 = arith.constant 0 : index
    %13 = vector.load %arg7[%c0_13, %c0_14, %c0_15] : memref<2x32x1xf32, #tpu.memory_space<vmem>>, vector<2x32x1xf32>
    tpu.vector_store %arg7[%c0_13, %c0_14, %c0_15], %12 {strides = array<i32>} : memref<2x32x1xf32, #tpu.memory_space<vmem>>, vector<2x32x1xf32>,
    %c0_i32_16 = arith.constant 0 : i32
    %14 = arith.cmpi eq, %arg1, %c0_i32_16 : i32
    %15 = arith.extui %14 : i1 to i32
    %c0_i32_17 = arith.constant 0 : i32
    %16 = arith.cmpi ne, %15, %c0_i32_17 : i32
    scf.if %16 {
      %c0_18 = arith.constant 0 : index
      %c0_19 = arith.constant 0 : index
      %17 = vector.load %arg3[%c0_18, %c0_19] : memref<2x32xf32, #tpu.memory_space<vmem>>, vector<2x32xf32>
      %c0_20 = arith.constant 0 : index
      %c0_21 = arith.constant 0 : index
      %18 = vector.load %arg4[%c0_20, %c0_21] : memref<32x2xf32, #tpu.memory_space<vmem>>, vector<32x2xf32>
      %19 = tpu.iota {dimensions = array<i32: 1>} : vector<32x2xi32>
      %c0_22 = arith.constant 0 : index
      %c0_23 = arith.constant 0 : index
      %c0_24 = arith.constant 0 : index
      %20 = vector.load %arg6[%c0_22, %c0_23, %c0_24] : memref<2x32x1xf32, #tpu.memory_space<vmem>>, vector<1x32x1xf32>
      %21 = vector.shape_cast %20 : vector<1x32x1xf32> to vector<32x1xf32>
      %cst_25 = arith.constant 3.906250e-03 : f32
      %22 = vector.broadcast %cst_25 : f32 to vector<32x1xf32>
      %23 = arith.mulf %21, %22 : vector<32x1xf32>
      %c0_26 = arith.constant 0 : index
      %c0_27 = arith.constant 0 : index
      %c0_28 = arith.constant 0 : index
      %24 = vector.load %arg7[%c0_26, %c0_27, %c0_28] : memref<2x32x1xf32, #tpu.memory_space<vmem>>, vector<1x32x1xf32>
      %25 = vector.shape_cast %24 : vector<1x32x1xf32> to vector<32x1xf32>
      %c0_i32_29 = arith.constant 0 : i32
      %26 = vector.broadcast %c0_i32_29 : i32 to vector<32x2xi32>
      %27 = arith.cmpi eq, %19, %26 : vector<32x2xi32>
      %28 = vector.shape_cast %23 : vector<32x1xf32> to vector<32x1xf32>
      %29 = vector.broadcast %28 : vector<32x1xf32> to vector<32x2xf32>
      %30 = vector.shape_cast %25 : vector<32x1xf32> to vector<32x1xf32>
      %31 = vector.broadcast %30 : vector<32x1xf32> to vector<32x2xf32>
      %32 = arith.select %27, %29, %31 : vector<32x2xi1>, vector<32x2xf32>
      %cst_30 = arith.constant dense<0.000000e+00> : vector<2x2xf32>
      %33 = tpu.matmul %17, %32, %cst_30 {dimension_numbers = #tpu.dot_dimension_numbers<[1], [0], [0], [1], [0, 0, 1, 1], [], []>} : vector<2x32xf32>, vector<32x2xf32>, vector<2x2xf32> -> vector<2x2xf32>
      %cst_31 = arith.constant 0.000000e+00 : f32
      %34 = vector.broadcast %cst_31 : f32 to vector<2x2xf32>
      %35 = arith.maximumf %33, %34 : vector<2x2xf32>
      %cst_32 = arith.constant dense<0.000000e+00> : vector<32x2xf32>
      %36 = tpu.matmul %18, %35, %cst_32 {dimension_numbers = #tpu.dot_dimension_numbers<[1], [0], [0], [1], [0, 0, 1, 1], [], []>} : vector<32x2xf32>, vector<2x2xf32>, vector<32x2xf32> -> vector<32x2xf32>
      %cst_33 = arith.constant dense<0.000000e+00> : vector<32xf32>
      %37 = vector.multi_reduction <add>, %36, %cst_33 [1] : vector<32x2xf32> to vector<32xf32>
      %38 = vector.shape_cast %37 : vector<32xf32> to vector<32x1xf32>
      %39 = arith.negf %38 : vector<32x1xf32>
      %40 = math.exp %39 : vector<32x1xf32>
      %cst_34 = arith.constant 1.000000e+00 : f32
      %41 = vector.broadcast %cst_34 : f32 to vector<32x1xf32>
      %42 = arith.addf %41, %40 : vector<32x1xf32>
      %43 = arith.divf %41, %42 : vector<32x1xf32>
      %c0_35 = arith.constant 0 : index
      %c0_36 = arith.constant 0 : index
      %c0_37 = arith.constant 0 : index
      %44 = vector.load %arg5[%c0_35, %c0_36, %c0_37] : memref<2x32x1xf32, #tpu.memory_space<vmem>>, vector<1x32x1xf32>
      %45 = vector.shape_cast %44 : vector<1x32x1xf32> to vector<32x1xf32>
      %46 = vector.shape_cast %43 : vector<32x1xf32> to vector<1x32x1xf32>
      tpu.vector_store %arg5[%c0_35, %c0_36, %c0_37], %46 {strides = array<i32>} : memref<2x32x1xf32, #tpu.memory_space<vmem>>, vector<1x32x1xf32>,
      %c1 = arith.constant 1 : index
      %c0_38 = arith.constant 0 : index
      %c0_39 = arith.constant 0 : index
      %47 = vector.load %arg6[%c1, %c0_38, %c0_39] : memref<2x32x1xf32, #tpu.memory_space<vmem>>, vector<1x32x1xf32>
      %48 = vector.shape_cast %47 : vector<1x32x1xf32> to vector<32x1xf32>
      %cst_40 = arith.constant 3.906250e-03 : f32
      %49 = vector.broadcast %cst_40 : f32 to vector<32x1xf32>
      %50 = arith.mulf %48, %49 : vector<32x1xf32>
      %c1_41 = arith.constant 1 : index
      %c0_42 = arith.constant 0 : index
      %c0_43 = arith.constant 0 : index
      %51 = vector.load %arg7[%c1_41, %c0_42, %c0_43] : memref<2x32x1xf32, #tpu.memory_space<vmem>>, vector<1x32x1xf32>
      %52 = vector.shape_cast %51 : vector<1x32x1xf32> to vector<32x1xf32>
      %c0_i32_44 = arith.constant 0 : i32
      %53 = vector.broadcast %c0_i32_44 : i32 to vector<32x2xi32>
      %54 = arith.cmpi eq, %19, %53 : vector<32x2xi32>
      %55 = vector.shape_cast %50 : vector<32x1xf32> to vector<32x1xf32>
      %56 = vector.broadcast %55 : vector<32x1xf32> to vector<32x2xf32>
      %57 = vector.shape_cast %52 : vector<32x1xf32> to vector<32x1xf32>
      %58 = vector.broadcast %57 : vector<32x1xf32> to vector<32x2xf32>
      %59 = arith.select %54, %56, %58 : vector<32x2xi1>, vector<32x2xf32>
      %cst_45 = arith.constant dense<0.000000e+00> : vector<2x2xf32>
      %60 = tpu.matmul %17, %59, %cst_45 {dimension_numbers = #tpu.dot_dimension_numbers<[1], [0], [0], [1], [0, 0, 1, 1], [], []>} : vector<2x32xf32>, vector<32x2xf32>, vector<2x2xf32> -> vector<2x2xf32>
      %cst_46 = arith.constant 0.000000e+00 : f32
      %61 = vector.broadcast %cst_46 : f32 to vector<2x2xf32>
      %62 = arith.maximumf %60, %61 : vector<2x2xf32>
      %cst_47 = arith.constant dense<0.000000e+00> : vector<32x2xf32>
      %63 = tpu.matmul %18, %62, %cst_47 {dimension_numbers = #tpu.dot_dimension_numbers<[1], [0], [0], [1], [0, 0, 1, 1], [], []>} : vector<32x2xf32>, vector<2x2xf32>, vector<32x2xf32> -> vector<32x2xf32>
      %cst_48 = arith.constant dense<0.000000e+00> : vector<32xf32>
      %64 = vector.multi_reduction <add>, %63, %cst_48 [1] : vector<32x2xf32> to vector<32xf32>
      %65 = vector.shape_cast %64 : vector<32xf32> to vector<32x1xf32>
      %66 = arith.negf %65 : vector<32x1xf32>
      %67 = math.exp %66 : vector<32x1xf32>
      %cst_49 = arith.constant 1.000000e+00 : f32
      %68 = vector.broadcast %cst_49 : f32 to vector<32x1xf32>
      %69 = arith.addf %68, %67 : vector<32x1xf32>
      %70 = arith.divf %68, %69 : vector<32x1xf32>
      %c1_50 = arith.constant 1 : index
      %c0_51 = arith.constant 0 : index
      %c0_52 = arith.constant 0 : index
      %71 = vector.load %arg5[%c1_50, %c0_51, %c0_52] : memref<2x32x1xf32, #tpu.memory_space<vmem>>, vector<1x32x1xf32>
      %72 = vector.shape_cast %71 : vector<1x32x1xf32> to vector<32x1xf32>
      %73 = vector.shape_cast %70 : vector<32x1xf32> to vector<1x32x1xf32>
      tpu.vector_store %arg5[%c1_50, %c0_51, %c0_52], %73 {strides = array<i32>} : memref<2x32x1xf32, #tpu.memory_space<vmem>>, vector<1x32x1xf32>,
    } else {
    }
    return
  }
  func.func @transform_0(%arg0: i32, %arg1: i32) -> (i32, i32, i32) {
    %c0_i32 = arith.constant 0 : i32
    %c0_i32_0 = arith.constant 0 : i32
    return %arg0, %c0_i32, %arg1 : i32, i32, i32
  }
  func.func @transform_1(%arg0: i32, %arg1: i32) -> (i32, i32) {
    %c0_i32 = arith.constant 0 : i32
    %c0_i32_0 = arith.constant 0 : i32
    %c0_i32_1 = arith.constant 0 : i32
    return %c0_i32, %c0_i32_0 : i32, i32
  }
  func.func @transform_2(%arg0: i32, %arg1: i32) -> (i32, i32) {
    %c0_i32 = arith.constant 0 : i32
    %c0_i32_0 = arith.constant 0 : i32
    %c0_i32_1 = arith.constant 0 : i32
    return %c0_i32, %c0_i32_0 : i32, i32
  }
  func.func @transform_3(%arg0: i32, %arg1: i32) -> (i32, i32, i32) {
    %c0_i32 = arith.constant 0 : i32
    %c0_i32_0 = arith.constant 0 : i32
    %c0_i32_1 = arith.constant 0 : i32
    return %arg0, %c0_i32, %c0_i32_0 : i32, i32, i32
  }
}

</mosaic_0001>

<bundles_post_ra>
// kernel: tpu_custom_call.1
= control target key start
LH: loop header
LB: loop body
LE: loop exit
PB: predicated region body
PF: predicated region fallthrough
CT: control target
= control target key end

     0   :  { %8 = vsyncpa [#allocation5], 0  ;;  %s911_s12 = smov [#allocation4]   ;;  %s1093_s0 = inlined_call_operand.hbm [shape: f32[2,32,256], index: 0, kind: input, shape index: {}]   ;;  %s1094_s1 = inlined_call_operand.vmem [shape: f32[2,32], index: 1, kind: input, shape index: {}]   ;;  %s1095_s2 = inlined_call_operand.vmem [shape: f32[32,2], index: 2, kind: input, shape index: {}]   ;;  %s1096_s3 = inlined_call_operand.vmem [shape: f32[2,32,1], index: 3, kind: output, shape index: {}]  }
   0x1   :  { %s14_s13 = sshll.u32 %s911_s12, 4  ;;  %s887_s16 = scalar_lea.hbm %s1093_s0, 2048  ;;  %s15_s13 = int_to_ptr.vmem [resolvable:$true] %s14_s13 }
   0x2   :  { %p888_p0 = scmp.ne.s32.totalorder %s1093_s0, %s887_s16  ;;  %p891_p1 = scmp.lt.u32.totalorder %s887_s16, %s1093_s0 }
   0x4   :  { %p893_p2 = pnand %p891_p1, %p888_p0 }
   0x6   :  { %896 = shalt.err (!%p893_p2)
}
   0x7   :  { %s897_s21 = scalar_lea.vmem %s15_s13, 2048  ;;  %p902_p4 = scmp.lt.s32.totalorder %s15_s13, %s15_s13 }
   0x8   :  { %p898_p3 = scmp.ne.s32.totalorder %s15_s13, %s897_s21  ;;  %p903_p5 = scmp.lt.s32.totalorder %s897_s21, %s897_s21 }
   0xa   :  { %p904_p6 = por %p903_p5, %p902_p4 }
   0xc   :  { %p905_p7 = pnand %p904_p6, %p898_p3 }
   0xe   :  { %908 = shalt.err (!%p905_p7)
}
   0xf   :  { %s912_s22 = smov 256   ;;  %s913_s23 = smov 16  }
  0x10   :  { %20 = dma.hbm_to_vmem [thread:$0]  %s1093_s0, 2048, %s15_s13, [#allocation5], %s912_s22, %s912_s22, %s913_s23  }
  0x11   :  { %909 = dma.done.wait [#allocation5], 2048  }
  0x12   :  { %910 = vsyncadd [#allocation5], 4294965248  ;;  %vm32_vm0 = vcmask 7168   ;;  %v914_v0 = vmov -inf   ;;  %v49_v1 = vld [vmem:[#allocation4] sm:$0xff]  ;;  %v50_v2 = vld [vmem:[#allocation4 + $0x8] sm:$0xff] }
  0x13   :  { %41 = vst.msk [vmem:[#allocation3] sm:$0xff] %vm32_vm0, %v914_v0  ;;  %42 = vst.msk [vmem:[#allocation3 + $0x8] sm:$0xff] %vm32_vm0, %v914_v0  ;;  %v51_v3 = vld [vmem:[#allocation4 + $0x10] sm:$0xff]  ;;  %v122_v4 = vmax.f32 %v49_v1, %v50_v2  ;;  %v73_v5 = vadd.f32 %v50_v2, %v49_v1  ;;  %v52_v6 = vld [vmem:[#allocation4 + $0x18] sm:$0xff]  ;;  %v915_v15 = vmov 0.0   ;;  %v916_v18 = vmov 0  }
  0x14   :  { %43 = vst.msk [vmem:[#allocation3 + $0x10] sm:$0xff] %vm32_vm0, %v914_v0  ;;  %44 = vst.msk [vmem:[#allocation3 + $0x18] sm:$0xff] %vm32_vm0, %v914_v0  ;;  %v125_v7 = vmax.f32 %v51_v3, %v52_v6  ;;  %v76_v8 = vadd.f32 %v52_v6, %v51_v3  ;;  %v55_v9 = vld [vmem:[#allocation4 + $0x30] sm:$0xff]  ;;  %v56_v10 = vld [vmem:[#allocation4 + $0x38] sm:$0xff]  ;;  %819 = vset.pattern.permute.xlu1 %v916_v18  ;;  %813 = vset.pattern.permute.xlu0 %v916_v18  ;;  %v917_v59 = vmov 0.0|0.0   ;;  %vm918_vm1 = vmmov 0  }
  0x15   :  { %45 = vst.msk [vmem:[#allocation3 + $0x20] sm:$0xff] %vm32_vm0, %v914_v0  ;;  %46 = vst.msk [vmem:[#allocation3 + $0x28] sm:$0xff] %vm32_vm0, %v914_v0  ;;  %123 = vmax.xlane.f32.xlu1 %v122_v4  ;;  %74 = vadd.xlane.f32.xlu0 %v73_v5  ;;  %v53_v11 = vld [vmem:[#allocation4 + $0x20] sm:$0xff]  ;;  %v54_v12 = vld [vmem:[#allocation4 + $0x28] sm:$0xff]  ;;  %v82_v13 = vadd.f32 %v56_v10, %v55_v9  ;;  %v131_v16 = vmax.f32 %v55_v9, %v56_v10  ;;  %vm229_vm3 = vcmask 261120   ;;  %vm304_vm4 = vcmask 15360  }
  0x16   :  { %47 = vst.msk [vmem:[#allocation3 + $0x30] sm:$0xff] %vm32_vm0, %v914_v0  ;;  %48 = vst.msk [vmem:[#allocation3 + $0x38] sm:$0xff] %vm32_vm0, %v914_v0  ;;  %v79_v14 = vadd.f32 %v54_v12, %v53_v11  ;;  %v128_v17 = vmax.f32 %v53_v11, %v54_v12  ;;  %791 = vmatprep.subr.bf16.mxu0 %v917_v59  ;;  %761 = vmatprep.mubr.msk.f32.mxu0 %vm918_vm1, %v915_v15  ;;  %v59_v60 = vld [vmem:[#allocation4 + $0x50] sm:$0xff]  ;;  %v60_v61 = vld [vmem:[#allocation4 + $0x58] sm:$0xff]  ;;  %v170_v12 = vlaneseq  ;;  %vm317_vm5 = vcmask 1041408  }
  0x17   :  { %33 = vst.msk [vmem:[#allocation2] sm:$0xff] %vm32_vm0, %v915_v15  ;;  %34 = vst.msk [vmem:[#allocation2 + $0x8] sm:$0xff] %vm32_vm0, %v915_v15  ;;  %v88_v62 = vadd.f32 %v60_v61, %v59_v60  ;;  %v61_v63 = vld [vmem:[#allocation4 + $0x60] sm:$0xff]  ;;  %v62_v0 = vld [vmem:[#allocation4 + $0x68] sm:$0xff]  ;;  %v137_v6 = vmax.f32 %v59_v60, %v60_v61 }
  0x18   :  { %35 = vst.msk [vmem:[#allocation2 + $0x10] sm:$0xff] %vm32_vm0, %v915_v15  ;;  %36 = vst.msk [vmem:[#allocation2 + $0x18] sm:$0xff] %vm32_vm0, %v915_v15  ;;  %v140_v1 = vmax.f32 %v61_v63, %v62_v0  ;;  %v57_v2 = vld [vmem:[#allocation4 + $0x40] sm:$0xff]  ;;  %v58_v3 = vld [vmem:[#allocation4 + $0x48] sm:$0xff] }
  0x19   :  { %126 = vmax.xlane.f32.xlu1 %v125_v7  ;;  %77 = vadd.xlane.f32.xlu0 %v76_v8  ;;  %37 = vst.msk [vmem:[#allocation2 + $0x20] sm:$0xff] %vm32_vm0, %v915_v15  ;;  %38 = vst.msk [vmem:[#allocation2 + $0x28] sm:$0xff] %vm32_vm0, %v915_v15  ;;  %v85_v4 = vadd.f32 %v58_v3, %v57_v2  ;;  %v134_v5 = vmax.f32 %v57_v2, %v58_v3  ;;  %v63_v8 = vld [vmem:[#allocation4 + $0x70] sm:$0xff]  ;;  %v64_v9 = vld [vmem:[#allocation4 + $0x78] sm:$0xff] }
  0x1a   :  { %39 = vst.msk [vmem:[#allocation2 + $0x30] sm:$0xff] %vm32_vm0, %v915_v15  ;;  %40 = vst.msk [vmem:[#allocation2 + $0x38] sm:$0xff] %vm32_vm0, %v915_v15  ;;  %v114_v19 = vld [vmem:[#allocation3] sm:$0xff]  ;;  %v115_v25 = vld [vmem:[#allocation3 + $0x8] sm:$0xff]  ;;  %v91_v7 = vadd.f32 %v62_v0, %v61_v63  ;;  %v94_v10 = vadd.f32 %v64_v9, %v63_v8  ;;  %v143_v11 = vmax.f32 %v63_v8, %v64_v9 }
  0x1b   :  { %v117_v37 = vld [vmem:[#allocation3 + $0x18] sm:$0xff]  ;;  %v116_v38 = vld [vmem:[#allocation3 + $0x10] sm:$0xff] }
  0x1d   :  { %83 = vadd.xlane.f32.xlu1 %v82_v13  ;;  %80 = vadd.xlane.f32.xlu0 %v79_v14  ;;  %v986_v13 = vand.u32 127, %v170_v12 }
  0x1e   :  { %v65_v20 = vld [vmem:[#allocation2] sm:$0xff]  ;;  %v66_v26 = vld [vmem:[#allocation2 + $0x8] sm:$0xff] }
  0x1f   :  { %v68_v31 = vld [vmem:[#allocation2 + $0x18] sm:$0xff]  ;;  %v67_v32 = vld [vmem:[#allocation2 + $0x10] sm:$0xff]  ;;  %vm184_vm2 = vcmp.eq.s32.totalorder %v986_v13, 0 }
  0x21   :  { %132 = vmax.xlane.f32.xlu1 %v131_v16  ;;  %129 = vmax.xlane.f32.xlu0 %v128_v17 }
  0xa2   :  { %v124_v21 = vpop.xlane.xlu1 %123  ;;  %v75_v22 = vpop.xlane.xlu0 %74 }
  0xa3   :  { %v146_v23 = vmax.f32 %v114_v19, %v124_v21  ;;  %v97_v24 = vadd.f32 %v75_v22, %v65_v20 }
  0xa5   :  { %154 = vst.msk [vmem:[#allocation3] sm:$0xff] %vm32_vm0, %v146_v23  ;;  %106 = vst.msk [vmem:[#allocation2] sm:$0xff] %vm32_vm0, %v97_v24 }
  0xa6   :  { %v127_v27 = vpop.xlane.xlu1 %126  ;;  %v78_v28 = vpop.xlane.xlu0 %77 }
  0xa7   :  { %v147_v29 = vmax.f32 %v115_v25, %v127_v27  ;;  %v98_v30 = vadd.f32 %v78_v28, %v66_v26 }
  0xa9   :  { %155 = vst.msk [vmem:[#allocation3 + $0x8] sm:$0xff] %vm32_vm0, %v147_v29  ;;  %107 = vst.msk [vmem:[#allocation2 + $0x8] sm:$0xff] %vm32_vm0, %v98_v30 }
  0xaa   :  { %v84_v33 = vpop.xlane.xlu1 %83  ;;  %v81_v34 = vpop.xlane.xlu0 %80 }
  0xab   :  { %v100_v35 = vadd.f32 %v84_v33, %v68_v31  ;;  %v99_v36 = vadd.f32 %v81_v34, %v67_v32  ;;  %v1001_v33 = vld [vmem:[%s1094_s1] sm:$0x3]  ;;  %v70_v34 = vld [vmem:[#allocation2 + $0x28] sm:$0xff] }
  0xac   :  { %v172_v41 = vld [vmem:[#allocation2] sm:$0xff] }
  0xad   :  { %109 = vst.msk [vmem:[#allocation2 + $0x18] sm:$0xff] %vm32_vm0, %v100_v35  ;;  %108 = vst.msk [vmem:[#allocation2 + $0x10] sm:$0xff] %vm32_vm0, %v99_v36  ;;  %v180_v44 = vld [vmem:[#allocation3] sm:$0xff]  ;;  %v176_v48 = vmul.f32 0.00390625, %v172_v41 }
  0xae   :  { %v133_v39 = vpop.xlane.xlu1 %132  ;;  %v130_v40 = vpop.xlane.xlu0 %129 }
  0xaf   :  { %v149_v42 = vmax.f32 %v117_v37, %v133_v39  ;;  %v148_v43 = vmax.f32 %v116_v38, %v130_v40  ;;  %v120_v37 = vld [vmem:[#allocation3 + $0x30] sm:$0xff]  ;;  %v69_v40 = vld [vmem:[#allocation2 + $0x20] sm:$0xff] }
  0xb0   :  { %v181_v45 = vld [vmem:[#allocation3 + $0x8] sm:$0xff] }
  0xb1   :  { %v173_v46 = vld [vmem:[#allocation2 + $0x8] sm:$0xff]  ;;  %157 = vst.msk [vmem:[#allocation3 + $0x18] sm:$0xff] %vm32_vm0, %v149_v42  ;;  %156 = vst.msk [vmem:[#allocation3 + $0x10] sm:$0xff] %vm32_vm0, %v148_v43  ;;  %v820_v47 = vpack.i.bf16 %v181_v45, %v180_v44  ;;  %v118_v43 = vld [vmem:[#allocation3 + $0x20] sm:$0xff] }
  0xb2   :  { %v177_v49 = vmul.f32 0.00390625, %v173_v46  ;;  %v119_v46 = vld [vmem:[#allocation3 + $0x28] sm:$0xff] }
  0xb3   :  { %821 = vperm.xlu1 %819, %v820_v47  }
  0xb4   :  { %v814_v50 = vpack.i.bf16 %v177_v49, %v176_v48  ;;  %v174_v51 = vld [vmem:[#allocation2 + $0x10] sm:$0xff]  ;;  %v175_v52 = vld [vmem:[#allocation2 + $0x18] sm:$0xff] }
  0xb5   :  { %v178_v53 = vmul.f32 0.00390625, %v174_v51  ;;  %v179_v54 = vmul.f32 0.00390625, %v175_v52  ;;  %v71_v51 = vld [vmem:[#allocation2 + $0x30] sm:$0xff] }
  0xb6   :  { %815 = vperm.xlu0 %813, %v814_v50  }
  0xb7   :  { %v825_v55 = vpack.i.bf16 %v179_v54, %v178_v53 }
  0xb8   :  { %v182_v56 = vld [vmem:[#allocation3 + $0x10] sm:$0xff]  ;;  %v183_v57 = vld [vmem:[#allocation3 + $0x18] sm:$0xff] }
  0xb9   :  { %826 = vperm.xlu1 %819, %v825_v55   ;;  %v830_v58 = vpack.i.bf16 %v183_v57, %v182_v56  ;;  %v72_v57 = vld [vmem:[#allocation2 + $0x38] sm:$0xff] }
  0xbd   :  { %831 = vperm.xlu1 %819, %v830_v58  }
  0xd5   :  { %89 = vadd.xlane.f32.xlu0 %v88_v62  ;;  %v121_v62 = vld [vmem:[#allocation3 + $0x38] sm:$0xff] }
  0xd9   :  { %141 = vmax.xlane.f32.xlu0 %v140_v1 }
  0xe1   :  { %86 = vadd.xlane.f32.xlu1 %v85_v4 }
  0xe5   :  { %135 = vmax.xlane.f32.xlu1 %v134_v5 }
  0xe9   :  { %138 = vmax.xlane.f32.xlu1 %v137_v6 }
  0xed   :  { %92 = vadd.xlane.f32.xlu1 %v91_v7 }
  0xf1   :  { %95 = vadd.xlane.f32.xlu1 %v94_v10 }
  0xf5   :  { %144 = vmax.xlane.f32.xlu1 %v143_v11  ;;  %v166_v11 = vld [vmem:[%s1095_s2] sm:$0xff] }
  0xf6   :  { %766 = vmatprep.mubr.msk.f32.mxu1 %vm304_vm4, %v166_v11 }
 0x132   :  { %v822_v14 = vpop.permute.xlu1 %821 }
 0x133   :  { %v824_v17 = vunpack.i.h.bf16 %v822_v14  ;;  %v823_v18 = vunpack.i.l.bf16 %v822_v14 }
 0x135   :  { %v816_v16 = vpop.permute.xlu0 %815 }
 0x136   :  { %v818_v19 = vunpack.i.h.bf16 %v816_v16  ;;  %v817_v20 = vunpack.i.l.bf16 %v816_v16 }
 0x138   :  { %v225_v21 = vsel %vm184_vm2, %v817_v20, %v823_v18  ;;  %v226_v22 = vsel %vm184_vm2, %v818_v19, %v824_v17  ;;  %v827_v23 = vpop.permute.xlu1 %826 }
 0x139   :  { %v792_v24 = vpack.c.bf16 %v226_v22, %v225_v21  ;;  %v829_v26 = vunpack.i.h.bf16 %v827_v23  ;;  %v828_v27 = vunpack.i.l.bf16 %v827_v23 }
 0x13b   :  { %793 = vmatpush3.bf16.msra.mxu0 %v792_v24 }
 0x13c   :  { %794 = vmatprep.subr.bf16.mxu0 %v917_v59  ;;  %v832_v25 = vpop.permute.xlu1 %831 }
 0x13d   :  { %v834_v28 = vunpack.i.h.bf16 %v832_v25  ;;  %v833_v29 = vunpack.i.l.bf16 %v832_v25 }
 0x13f   :  { %v227_v30 = vsel %vm184_vm2, %v828_v27, %v833_v29  ;;  %v228_v31 = vsel %vm184_vm2, %v829_v26, %v834_v28  ;;  %v167_v29 = vld [vmem:[%s1095_s2 + $0x8] sm:$0xff] }
 0x140   :  { %v795_v32 = vpack.c.bf16 %v228_v31, %v227_v30 }
 0x142   :  { %796 = vmatpush3.bf16.msra.mxu0 %v795_v32  ;;  %v168_v32 = vld [vmem:[%s1095_s2 + $0x10] sm:$0xff] }
 0x145   :  { %762 = vmatmul.mubr.msk.f32.vlgmr.msra.gmra.mrb[0].mxu0 %vm229_vm3, %v1001_v33 }
 0x146   :  { %785 = vmatprep.mubr.msk.f32.mxu0 %vm304_vm4, %v166_v11 }
 0x162   :  { %v90_v35 = vpop.xlane.xlu0 %89 }
 0x163   :  { %v102_v36 = vadd.f32 %v90_v35, %v70_v34 }
 0x165   :  { %111 = vst.msk [vmem:[#allocation2 + $0x28] sm:$0xff] %vm32_vm0, %v102_v36 }
 0x166   :  { %v142_v38 = vpop.xlane.xlu0 %141 }
 0x167   :  { %v152_v39 = vmax.f32 %v120_v37, %v142_v38  ;;  %v169_v37 = vld [vmem:[%s1095_s2 + $0x18] sm:$0xff] }
 0x169   :  { %160 = vst.msk [vmem:[#allocation3 + $0x30] sm:$0xff] %vm32_vm0, %v152_v39 }
 0x16c   :  { %v448_v47 = vld [vmem:[#allocation2 + $0x28] sm:$0xff] }
 0x16d   :  { %v452_v50 = vmul.f32 0.00390625, %v448_v47 }
 0x16e   :  { %v87_v41 = vpop.xlane.xlu1 %86 }
 0x16f   :  { %v101_v42 = vadd.f32 %v87_v41, %v69_v40 }
 0x170   :  { %v458_v7 = vld [vmem:[#allocation3 + $0x30] sm:$0xff] }
 0x171   :  { %110 = vst.msk [vmem:[#allocation2 + $0x20] sm:$0xff] %vm32_vm0, %v101_v42 }
 0x172   :  { %v136_v44 = vpop.xlane.xlu1 %135 }
 0x173   :  { %v150_v45 = vmax.f32 %v118_v43, %v136_v44 }
 0x175   :  { %158 = vst.msk [vmem:[#allocation3 + $0x20] sm:$0xff] %vm32_vm0, %v150_v45 }
 0x176   :  { %v139_v48 = vpop.xlane.xlu1 %138 }
 0x177   :  { %v151_v49 = vmax.f32 %v119_v46, %v139_v48 }
 0x178   :  { %v447_v52 = vld [vmem:[#allocation2 + $0x20] sm:$0xff] }
 0x179   :  { %159 = vst.msk [vmem:[#allocation3 + $0x28] sm:$0xff] %vm32_vm0, %v151_v49  ;;  %v451_v53 = vmul.f32 0.00390625, %v447_v52 }
 0x17a   :  { %v93_v54 = vpop.xlane.xlu1 %92 }
 0x17b   :  { %v103_v55 = vadd.f32 %v93_v54, %v71_v51  ;;  %v840_v56 = vpack.i.bf16 %v452_v50, %v451_v53 }
 0x17c   :  { %v456_v60 = vld [vmem:[#allocation3 + $0x20] sm:$0xff] }
 0x17d   :  { %112 = vst.msk [vmem:[#allocation2 + $0x30] sm:$0xff] %vm32_vm0, %v103_v55  ;;  %841 = vperm.xlu0 %813, %v840_v56  }
 0x17e   :  { %v96_v58 = vpop.xlane.xlu1 %95 }
 0x17f   :  { %v104_v61 = vadd.f32 %v96_v58, %v72_v57 }
 0x180   :  { %v457_v63 = vld [vmem:[#allocation3 + $0x28] sm:$0xff] }
 0x181   :  { %113 = vst.msk [vmem:[#allocation2 + $0x38] sm:$0xff] %vm32_vm0, %v104_v61  ;;  %v835_v0 = vpack.i.bf16 %v457_v63, %v456_v60 }
 0x182   :  { %v145_v1 = vpop.xlane.xlu1 %144 }
 0x183   :  { %v153_v2 = vmax.f32 %v121_v62, %v145_v1  ;;  %836 = vperm.xlu1 %819, %v835_v0  }
 0x184   :  { %v449_v3 = vld [vmem:[#allocation2 + $0x30] sm:$0xff] }
 0x185   :  { %161 = vst.msk [vmem:[#allocation3 + $0x38] sm:$0xff] %vm32_vm0, %v153_v2  ;;  %v453_v4 = vmul.f32 0.00390625, %v449_v3 }
 0x188   :  { %v450_v5 = vld [vmem:[#allocation2 + $0x38] sm:$0xff] }
 0x189   :  { %v454_v6 = vmul.f32 0.00390625, %v450_v5 }
 0x18b   :  { %v845_v8 = vpack.i.bf16 %v454_v6, %v453_v4 }
 0x18c   :  { %v459_v9 = vld [vmem:[#allocation3 + $0x38] sm:$0xff] }
 0x18d   :  { %846 = vperm.xlu1 %819, %v845_v8   ;;  %v850_v10 = vpack.i.bf16 %v459_v9, %v458_v7 }
 0x18f   :  { %851 = vperm.xlu0 %813, %v850_v10  }
 0x1fc   :  { %v842_v14 = vpop.permute.xlu0 %841 }
 0x1fd   :  { %v843_v18 = vunpack.i.l.bf16 %v842_v14  ;;  %v844_v20 = vunpack.i.h.bf16 %v842_v14 }
 0x202   :  { %v837_v12 = vpop.permute.xlu1 %836 }
 0x203   :  { %v838_v16 = vunpack.i.l.bf16 %v837_v12  ;;  %v839_v17 = vunpack.i.h.bf16 %v837_v12 }
 0x205   :  { %v500_v21 = vsel %vm184_vm2, %v843_v18, %v838_v16  ;;  %v501_v24 = vsel %vm184_vm2, %v844_v20, %v839_v17 }
 0x206   :  { %v798_v34 = vpack.c.bf16 %v501_v24, %v500_v21 }
 0x20c   :  { %v847_v22 = vpop.permute.xlu1 %846 }
 0x20d   :  { %v849_v30 = vunpack.i.h.bf16 %v847_v22  ;;  %v848_v31 = vunpack.i.l.bf16 %v847_v22 }
 0x20e   :  { %v852_v19 = vpop.permute.xlu0 %851 }
 0x20f   :  { %v854_v25 = vunpack.i.h.bf16 %v852_v19  ;;  %v853_v26 = vunpack.i.l.bf16 %v852_v19 }
 0x211   :  { %v503_v35 = vsel %vm184_vm2, %v849_v30, %v854_v25  ;;  %v502_v36 = vsel %vm184_vm2, %v848_v31, %v853_v26 }
 0x212   :  { %v801_v38 = vpack.c.bf16 %v503_v35, %v502_v36 }
 0x218   :  { %v299_v23 = vpop.f32.mrb[0].mxu0 }
 0x219   :  { %v303_v27 = vmax.f32 %v299_v23, 0.0  ;;  %v763_v28 = vpop.f32.mrb[1].mxu0 }
 0x21b   :  { %764 = vmatprep.subr.msk.mxu1 %vm317_vm5, %v303_v27 }
 0x21c   :  { %765 = vmatpush3.msk.msra.mxu1 %vm317_vm5, %v303_v27 }
 0x21d   :  { %767 = vmatmul.mubr.msk.f32.vlgmr.msra.gmra.mrb[0].mxu1 %vm304_vm4, %v167_v29  ;;  %797 = vmatprep.subr.bf16.mxu1 %v917_v59 }
 0x21e   :  { %799 = vmatpush3.bf16.msra.mxu1 %v798_v34  ;;  %769 = vmatprep.mubr.msk.f32.mxu1 %vm304_vm4, %v168_v32 }
 0x21f   :  { %800 = vmatprep.subr.bf16.mxu1 %v917_v59 }
 0x221   :  { %770 = vmatmul.mubr.msk.f32.gmra.mrb[2].mxu1 %vm304_vm4, %v169_v37 }
 0x222   :  { %802 = vmatpush3.bf16.msra.mxu1 %v801_v38  ;;  %780 = vmatprep.mubr.msk.f32.mxu1 %vm918_vm1, %v915_v15 }
 0x225   :  { %781 = vmatmul.mubr.msk.f32.vlgmr.msra.gmra.mrb[4].mxu1 %vm229_vm3, %v1001_v33 }
 0x226   :  { %788 = vmatprep.mubr.msk.f32.mxu1 %vm304_vm4, %v168_v32 }
 0x2f0   :  { %v768_v13 = vpop.f32.mrb[0].mxu1 }
 0x2f1   :  { %v387_v39 = vpop.f32.mrb[1].mxu1  ;;  %v409_v40 = vsel %vm304_vm4, %v768_v13, 0.0 }
 0x2f2   :  { %410 = vadd.xlane.f32.xlu0 %v409_v40  ;;  %v406_v41 = vsel %vm304_vm4, %v387_v39, 0.0 }
 0x2f3   :  { %407 = vadd.xlane.f32.xlu1 %v406_v41 }
 0x2f4   :  { %v771_v59 = vpop.f32.mrb[2].mxu1 }
 0x2f5   :  { %v397_v42 = vpop.f32.mrb[3].mxu1  ;;  %v415_v43 = vsel %vm304_vm4, %v771_v59, 0.0 }
 0x2f6   :  { %v412_v44 = vsel %vm304_vm4, %v397_v42, 0.0 }
 0x2f7   :  { %416 = vadd.xlane.f32.xlu1 %v415_v43  ;;  %413 = vadd.xlane.f32.xlu0 %v412_v44 }
 0x2f8   :  { %v570_v15 = vpop.f32.mrb[4].mxu1 }
 0x2f9   :  { %v574_v33 = vmax.f32 %v570_v15, 0.0  ;;  %v782_v45 = vpop.f32.mrb[5].mxu1 }
 0x2fb   :  { %783 = vmatprep.subr.msk.mxu0 %vm317_vm5, %v574_v33  ;;  %803 = vmatprep.subr.msk.mxu1 %vm317_vm5, %v574_v33 }
 0x2fc   :  { %784 = vmatpush3.msk.msra.mxu0 %vm317_vm5, %v574_v33  ;;  %804 = vmatpush3.msk.msra.mxu1 %vm317_vm5, %v574_v33 }
 0x2fd   :  { %786 = vmatmul.mubr.msk.f32.vlgmr.msra.gmra.mrb[2].mxu0 %vm304_vm4, %v167_v29  ;;  %789 = vmatmul.mubr.msk.f32.vlgmr.msra.gmra.mrb[6].mxu1 %vm304_vm4, %v169_v37 }
 0x37f   :  { %v411_v46 = vpop.xlane.xlu0 %410 }
 0x380   :  { %v716_v47 = vmul.f32 -1.442695, %v411_v46  ;;  %v408_v48 = vpop.xlane.xlu1 %407 }
 0x381   :  { %v715_v49 = vmul.f32 -1.442695, %v408_v48 }
 0x382   :  { %855 = vpow2.f32 %v716_v47 }
 0x383   :  { %857 = vpow2.f32 %v715_v49 }
 0x384   :  { %v417_v50 = vpop.xlane.xlu1 %416  ;;  %v414_v51 = vpop.xlane.xlu0 %413 }
 0x385   :  { %v718_v52 = vmul.f32 -1.442695, %v417_v50  ;;  %v717_v53 = vmul.f32 -1.442695, %v414_v51 }
 0x387   :  { %859 = vpow2.f32 %v718_v52 }
 0x388   :  { %861 = vpow2.f32 %v717_v53 }
 0x38c   :  { %v856_v54 = vpop.eup %855 }
 0x38d   :  { %v858_v55 = vpop.eup %857  ;;  %v431_v56 = vadd.f32 1.0, %v856_v54 }
 0x38e   :  { %v430_v57 = vadd.f32 1.0, %v858_v55 }
 0x38f   :  { %863 = vrcp.f32 %v431_v56 }
 0x390   :  { %865 = vrcp.f32 %v430_v57 }
 0x391   :  { %v860_v58 = vpop.eup %859 }
 0x392   :  { %v862_v60 = vpop.eup %861  ;;  %v433_v61 = vadd.f32 1.0, %v860_v58 }
 0x393   :  { %v432_v62 = vadd.f32 1.0, %v862_v60 }
 0x394   :  { %867 = vrcp.f32 %v433_v61 }
 0x395   :  { %869 = vrcp.f32 %v432_v62 }
 0x399   :  { %v864_v63 = vpop.eup %863 }
 0x39a   :  { %v866_v0 = vpop.eup %865  ;;  %443 = vst.msk [vmem:[%s1096_s3 + $0x8] sm:$0xff] %vm32_vm0, %v864_v63 }
 0x39b   :  { %442 = vst.msk [vmem:[%s1096_s3] sm:$0xff] %vm32_vm0, %v866_v0 }
 0x39e   :  { %v868_v1 = vpop.eup %867 }
 0x39f   :  { %v870_v2 = vpop.eup %869  ;;  %445 = vst.msk [vmem:[%s1096_s3 + $0x18] sm:$0xff] %vm32_vm0, %v868_v1 }
 0x3a0   :  { %444 = vst.msk [vmem:[%s1096_s3 + $0x10] sm:$0xff] %vm32_vm0, %v870_v2 }
 0x3d0   :  { %v787_v3 = vpop.f32.mrb[2].mxu0  ;;  %v790_v4 = vpop.f32.mrb[6].mxu1 }
 0x3d1   :  { %v644_v5 = vpop.f32.mrb[3].mxu0  ;;  %v666_v6 = vsel %vm304_vm4, %v787_v3, 0.0  ;;  %v654_v7 = vpop.f32.mrb[7].mxu1  ;;  %v672_v9 = vsel %vm304_vm4, %v790_v4, 0.0 }
 0x3d2   :  { %667 = vadd.xlane.f32.xlu1 %v666_v6  ;;  %v663_v8 = vsel %vm304_vm4, %v644_v5, 0.0  ;;  %v669_v10 = vsel %vm304_vm4, %v654_v7, 0.0 }
 0x3d3   :  { %664 = vadd.xlane.f32.xlu0 %v663_v8 }
 0x3d6   :  { %673 = vadd.xlane.f32.xlu1 %v672_v9 }
 0x3d7   :  { %670 = vadd.xlane.f32.xlu0 %v669_v10 }
 0x45f   :  { %v668_v11 = vpop.xlane.xlu1 %667 }
 0x460   :  { %v726_v12 = vmul.f32 -1.442695, %v668_v11  ;;  %v665_v14 = vpop.xlane.xlu0 %664 }
 0x461   :  { %v725_v16 = vmul.f32 -1.442695, %v665_v14 }
 0x462   :  { %871 = vpow2.f32 %v726_v12 }
 0x463   :  { %873 = vpow2.f32 %v725_v16  ;;  %v674_v17 = vpop.xlane.xlu1 %673 }
 0x464   :  { %v728_v18 = vmul.f32 -1.442695, %v674_v17  ;;  %v671_v19 = vpop.xlane.xlu0 %670 }
 0x465   :  { %v727_v20 = vmul.f32 -1.442695, %v671_v19 }
 0x466   :  { %875 = vpow2.f32 %v728_v18 }
 0x467   :  { %877 = vpow2.f32 %v727_v20 }
 0x46c   :  { %v872_v21 = vpop.eup %871 }
 0x46d   :  { %v874_v22 = vpop.eup %873  ;;  %v688_v23 = vadd.f32 1.0, %v872_v21 }
 0x46e   :  { %v687_v24 = vadd.f32 1.0, %v874_v22 }
 0x46f   :  { %879 = vrcp.f32 %v688_v23 }
 0x470   :  { %v876_v25 = vpop.eup %875  ;;  %881 = vrcp.f32 %v687_v24 }
 0x471   :  { %v878_v26 = vpop.eup %877  ;;  %v690_v27 = vadd.f32 1.0, %v876_v25 }
 0x472   :  { %v689_v28 = vadd.f32 1.0, %v878_v26 }
 0x473   :  { %883 = vrcp.f32 %v690_v27 }
 0x474   :  { %885 = vrcp.f32 %v689_v28 }
 0x479   :  { %v880_v29 = vpop.eup %879 }
 0x47a   :  { %v882_v30 = vpop.eup %881  ;;  %730 = vst.msk [vmem:[%s1096_s3 + $0x28] sm:$0xff] %vm32_vm0, %v880_v29 }
 0x47b   :  { %729 = vst.msk [vmem:[%s1096_s3 + $0x20] sm:$0xff] %vm32_vm0, %v882_v30 }
 0x47d   :  { %v884_v31 = vpop.eup %883 }
 0x47e   :  { %v886_v32 = vpop.eup %885  ;;  %732 = vst.msk [vmem:[%s1096_s3 + $0x38] sm:$0xff] %vm32_vm0, %v884_v31 }
 0x47f   :  { %731 = vst.msk [vmem:[%s1096_s3 + $0x30] sm:$0xff] %vm32_vm0, %v886_v32 }
 0x480   :  { %708 = vsyncpa [#allocation5], 1 }

</bundles_post_ra>
